<compile_context>
chip_gen: v6e
topology: v6e:2x2x1
jax: 0.10.0
libtpu: 0.0.40
codegen_flags: <defaults>
</compile_context>

<pallas_src>
import jax
import jax.numpy as jnp
from jax.experimental import pallas as pl
from jax.experimental.pallas import tpu as pltpu


def stopnet_kernel(x_ref, w_ref, b_ref, o_ref):
    # x_ref: (TM, F) VMEM tile of the input (native dtype).
    # w_ref: (F, 1)  VMEM weight column in x.dtype, resident across the grid.
    # b_ref: (1, 1)  SMEM scalar bias (f32).
    # o_ref: (TM, 1) VMEM output tile.
    # dropout is identity in eval mode.
    z = jnp.dot(x_ref[...], w_ref[...], preferred_element_type=jnp.float32)  # (TM, 1) f32
    o_ref[...] = jax.nn.sigmoid(z + b_ref[0, 0]).astype(o_ref.dtype)


def _round_up(v, m):
    return ((v + m - 1) // m) * m


def stopnet_forward(x, weight, bias, *, tm=None):
    """StopNet forward.

    x:      [B, F]  activations (f32 or bf16).
    weight: [1, F]  PyTorch Linear.weight layout.
    bias:   [1]     PyTorch Linear.bias.
    Returns [B, 1]  sigmoid(x @ weight.T + bias).
    """
    B, F = x.shape
    itemsize = x.dtype.itemsize

    if tm is None:
        # ~8 MiB per x buffer (double-buffered -> 16 MiB), generous row cap.
        target_bytes = 8 * 1024 * 1024
        tm = target_bytes // max(1, F * itemsize)
        tm = min(tm, 4096)
        tm = max(8, (tm // 8) * 8)
        # Ensure >= ~4 tiles when B permits so both v7x TCs get work.
        if B >= 32:
            tm = min(tm, _round_up(pl.cdiv(B, 4), 8))
    tm = max(8, _round_up(tm, 8))          # sublane alignment
    tm = min(tm, _round_up(B, 8))          # don't over-tile tiny batches
    num_tiles = pl.cdiv(B, tm)             # ragged last block handled by Pallas

    w_col = weight.reshape(F, 1).astype(x.dtype)      # resident, pre-cast once
    b_smem = bias.reshape(1, 1).astype(jnp.float32)   # scalar, lives in SMEM

    out = pl.pallas_call(
        stopnet_kernel,
        out_shape=jax.ShapeDtypeStruct((B, 1), x.dtype),
        grid=(num_tiles,),
        in_specs=[
            pl.BlockSpec((tm, F), lambda i: (i, 0)),             # x tile (pipelined)
            pl.BlockSpec((F, 1), lambda i: (0, 0)),              # weight column (resident)
            pl.BlockSpec(memory_space=pltpu.MemorySpace.SMEM),   # bias scalar
        ],
        out_specs=pl.BlockSpec((tm, 1), lambda i: (i, 0)),
        compiler_params=pltpu.CompilerParams(
            dimension_semantics=("parallel",),   # shards tiles across TCs on v7x
            vmem_limit_bytes=48 * 1024 * 1024,   # safe on v7x (64 MiB VMEM)
        ),
    )(x, w_col, b_smem)
    return out


def init_params(in_features, key):
    """Matches StopNet.__init__: xavier_uniform weight (gain=1), default bias."""
    kw, kb = jax.random.split(key)
    fan_in, fan_out = in_features, 1
    bound_w = jnp.sqrt(6.0 / (fan_in + fan_out))
    weight = jax.random.uniform(kw, (1, in_features), jnp.float32,
                                minval=-bound_w, maxval=bound_w)
    bound_b = 1.0 / jnp.sqrt(fan_in)
    bias = jax.random.uniform(kb, (1,), jnp.float32,
                              minval=-bound_b, maxval=bound_b)
    return weight, bias


if __name__ == "__main__":
    key = jax.random.PRNGKey(0)
    k_x, k_p, k_x2 = jax.random.split(key, 3)

    # Small shape consistent with the module.
    B, in_features = 8, 32
    x = jax.random.normal(k_x, (B, in_features), jnp.float32)
    weight, bias = init_params(in_features, k_p)

    out = jax.block_until_ready(stopnet_forward(x, weight, bias))
    ref = jax.nn.sigmoid(jnp.sum(x * weight, axis=-1, keepdims=True) + bias)
    assert out.shape == (B, 1)
    assert jnp.allclose(out, ref, atol=1e-5, rtol=1e-5)

    # Second check: multi-tile pipelined path with a ragged last block
    # (B % tm != 0, no host-side padding anywhere).
    B2, F2 = 300, 256
    x2 = jax.random.normal(k_x2, (B2, F2), jnp.float32)
    w2, b2 = init_params(F2, k_p)
    out2 = jax.block_until_ready(stopnet_forward(x2, w2, b2, tm=64))
    ref2 = jax.nn.sigmoid(jnp.sum(x2 * w2, axis=-1, keepdims=True) + b2)
    assert out2.shape == (B2, 1)
    assert jnp.allclose(out2, ref2, atol=1e-5, rtol=1e-5)

    # Third check: default byte-sized tiling path (tm chosen automatically).
    out3 = jax.block_until_ready(stopnet_forward(x2, w2, b2))
    assert out3.shape == (B2, 1)
    assert jnp.allclose(out3, ref2, atol=1e-5, rtol=1e-5)

    print("KERNEL_OK")
</pallas_src>

<mosaic_0001>
module attributes {stable_mosaic.version = 11 : i64} {
  func.func @stopnet_kernel(%arg0: i32, %arg1: memref<8x32xf32, #tpu.memory_space<vmem>>, %arg2: memref<32x1xf32, #tpu.memory_space<vmem>>, %arg3: memref<1x1xf32, #tpu.memory_space<smem>>, %arg4: memref<8x1xf32, #tpu.memory_space<vmem>>) attributes {dimension_semantics = [#tpu.dimension_semantics<parallel>], iteration_bounds = array<i64: 1>, scalar_prefetch = 0 : i64, scratch_operands = 0 : i64, tpu.core_type = #tpu.core_type<tc>, window_params = [{transform_indices = @transform_0, window_bounds = array<i64: 8, 32>}, {pipeline_mode = #tpu.pipeline_mode<synchronous>, transform_indices = @transform_1, window_bounds = array<i64: 32, 1>}, {transform_indices = @transform_2, window_bounds = array<i64: 1, 1>}, {transform_indices = @transform_3, window_bounds = array<i64: 8, 1>}]} {
    %c0 = arith.constant 0 : index
    %c0_0 = arith.constant 0 : index
    %0 = vector.load %arg1[%c0, %c0_0] : memref<8x32xf32, #tpu.memory_space<vmem>>, vector<8x32xf32>
    %c0_1 = arith.constant 0 : index
    %c0_2 = arith.constant 0 : index
    %1 = vector.load %arg2[%c0_1, %c0_2] : memref<32x1xf32, #tpu.memory_space<vmem>>, vector<32x1xf32>
    %cst = arith.constant dense<0.000000e+00> : vector<8x1xf32>
    %2 = tpu.matmul %0, %1, %cst {dimension_numbers = #tpu.dot_dimension_numbers<[1], [0], [0], [1], [0, 0, 1, 1], [], []>} : vector<8x32xf32>, vector<32x1xf32>, vector<8x1xf32> -> vector<8x1xf32>
    %c0_3 = arith.constant 0 : index
    %c0_4 = arith.constant 0 : index
    %3 = memref.load %arg3[%c0_3, %c0_4] : memref<1x1xf32, #tpu.memory_space<smem>>
    %4 = vector.broadcast %3 : f32 to vector<8x1xf32>
    %5 = arith.addf %2, %4 : vector<8x1xf32>
    %6 = arith.negf %5 : vector<8x1xf32>
    %7 = math.exp %6 : vector<8x1xf32>
    %cst_5 = arith.constant 1.000000e+00 : f32
    %8 = vector.broadcast %cst_5 : f32 to vector<8x1xf32>
    %9 = arith.addf %8, %7 : vector<8x1xf32>
    %10 = arith.divf %8, %9 : vector<8x1xf32>
    %c0_6 = arith.constant 0 : index
    %c0_7 = arith.constant 0 : index
    %11 = vector.load %arg4[%c0_6, %c0_7] : memref<8x1xf32, #tpu.memory_space<vmem>>, vector<8x1xf32>
    tpu.vector_store %arg4[%c0_6, %c0_7], %10 {strides = array<i32>} : memref<8x1xf32, #tpu.memory_space<vmem>>, vector<8x1xf32>,
    return
  }
  func.func @transform_0(%arg0: i32) -> (i32, i32) {
    %c0_i32 = arith.constant 0 : i32
    %c0_i32_0 = arith.constant 0 : i32
    return %arg0, %c0_i32 : i32, i32
  }
  func.func @transform_1(%arg0: i32) -> (i32, i32) {
    %c0_i32 = arith.constant 0 : i32
    %c0_i32_0 = arith.constant 0 : i32
    %c0_i32_1 = arith.constant 0 : i32
    return %c0_i32, %c0_i32_0 : i32, i32
  }
  func.func @transform_2(%arg0: i32) -> (i32, i32) {
    %c0_i32 = arith.constant 0 : i32
    %c0_i32_0 = arith.constant 0 : i32
    %c0_i32_1 = arith.constant 0 : i32
    return %c0_i32, %c0_i32_0 : i32, i32
  }
  func.func @transform_3(%arg0: i32) -> (i32, i32) {
    %c0_i32 = arith.constant 0 : i32
    %c0_i32_0 = arith.constant 0 : i32
    return %arg0, %c0_i32 : i32, i32
  }
}

</mosaic_0001>

<bundles_post_ra>
// kernel: tpu_custom_call.1
= control target key start
LH: loop header
LB: loop body
LE: loop exit
PB: predicated region body
PF: predicated region fallthrough
CT: control target
= control target key end

     0   :  { %v132_v0 = vmov 0.0   ;;  %vm133_vm0 = vmmov 0   ;;  %vm22_vm1 = vcmask 261120   ;;  %vm102_vm2 = vcmask 7168   ;;  %s175_s1 = inlined_call_operand.vmem [shape: f32[32,1], index: 1, kind: input, shape index: {}]   ;;  %s176_s0 = inlined_call_operand.vmem [shape: f32[8,32], index: 0, kind: input, shape index: {}]   ;;  %s177_s2 = inlined_call_operand.<no memory space> [shape: f32[1,1], index: 2, kind: input, shape index: {}]   ;;  %s178_s3 = inlined_call_operand.vmem [shape: f32[8,1], index: 3, kind: output, shape index: {}]  }
   0x1   :  { %115 = vmatprep.subr.mxu0 %v132_v0  ;;  %v19_v1 = vld [vmem:[%s175_s1 + $0x18] sm:$0xff]  ;;  %v18_v2 = vld [vmem:[%s175_s1 + $0x10] sm:$0xff]  ;;  %123 = vmatprep.mubr.msk.f32.mxu0 %vm133_vm0, %v132_v0  ;;  %v17_v3 = vld [vmem:[%s175_s1 + $0x8] sm:$0xff]  ;;  %v21_v6 = vstv %s177_s2 }
   0x2   :  { %116 = vmatpush3.msra.mxu0 %v19_v1  ;;  %v16_v4 = vld [vmem:[%s175_s1] sm:$0xff] }
   0x3   :  { %117 = vmatprep.subr.mxu0 %v132_v0  ;;  %v15_v5 = vld [vmem:[%s176_s0] sm:$0xff] }
   0x4   :  { %118 = vmatpush3.msra.mxu0 %v18_v2 }
   0x5   :  { %119 = vmatprep.subr.mxu0 %v132_v0 }
   0x6   :  { %120 = vmatpush3.msra.mxu0 %v17_v3 }
   0x7   :  { %121 = vmatprep.subr.mxu0 %v132_v0 }
   0x8   :  { %122 = vmatpush3.msra.mxu0 %v16_v4 }
   0x9   :  { %124 = vmatmul.mubr.msk.f32.vlgmr.msra.gmra.mxu0 %vm22_vm1, %v15_v5 }
  0xc9   :  { %v92_v7 = vpop.f32.mrf.mxu0 }
  0xca   :  { %v93_v8 = vadd.f32 %v92_v7, %v21_v6 }
  0xcb   :  { %v125_v9 = vpop.f32.mrf.mxu0 }
  0xcc   :  { %v109_v10 = vmul.f32 -1.442695, %v93_v8 }
  0xce   :  { %128 = vpow2.f32 %v109_v10 }
  0xdb   :  { %v129_v11 = vpop.eup %128 }
  0xdc   :  { %v99_v12 = vadd.f32 1.0, %v129_v11 }
  0xde   :  { %130 = vrcp.f32 %v99_v12 }
  0xeb   :  { %v131_v13 = vpop.eup %130 }
  0xec   :  { %103 = vst.msk [vmem:[%s178_s3] sm:$0xff] %vm102_vm2, %v131_v13 }

</bundles_post_ra>
